<compile_context>
chip_gen: v7x
topology: tpu7x:2x2x1
jax: 0.10.0
libtpu: 0.0.40
codegen_flags: <defaults>
</compile_context>

<pallas_src>
import jax
import jax.numpy as jnp
from jax.experimental import pallas as pl
from jax.experimental.pallas import tpu as pltpu


def _make_embedding_kernel(tokens_per_tile: int, fold: int, emb_dim: int):
    rows_per_tile = tokens_per_tile // fold

    def kernel(idx_ref, w_ref, o_ref):
        # idx_ref: SMEM (N,) int32 token ids (full array, scalar-prefetched)
        # w_ref:   VMEM (V, D) embedding table (resident, constant block index)
        # o_ref:   VMEM (rows_per_tile, fold * D) lane-dense output tile
        base = pl.program_id(0) * tokens_per_tile
        for r in range(rows_per_tile):          # static unroll over output rows
            for j in range(fold):               # static unroll over lane groups
                tok = idx_ref[base + r * fold + j]      # scalar SMEM read
                row = w_ref[pl.ds(tok, 1), :]           # (1, D) dynamic row load
                o_ref[r:r + 1, j * emb_dim:(j + 1) * emb_dim] = row

    return kernel


def embedding_lookup(x, w, *, tile_tokens: int = 256):
    """x: [B, S] int token ids; w: [V, D] float table -> [B, S, D] gathered rows."""
    B, S = x.shape
    V, D = w.shape
    N = B * S

    # Pack `fold` consecutive tokens into one 128-lane output row when D < 128.
    fold = 128 // D if (D < 128 and 128 % D == 0) else 1
    assert N % fold == 0, "token count must be a multiple of 128 // D"

    tile = min(tile_tokens, N)
    assert tile % fold == 0, "tile_tokens must be a multiple of 128 // D"
    assert N % tile == 0, "token count must be a multiple of the tile size"
    rows_per_tile = tile // fold
    if N // tile > 1:
        # (8, 128) tiling constraint on the output block when it isn't the full array.
        assert rows_per_tile % 8 == 0, "tile_tokens // fold must be a multiple of 8"

    idx_flat = x.reshape(N).astype(jnp.int32)
    kernel = _make_embedding_kernel(tile, fold, D)

    out_folded = pl.pallas_call(
        kernel,
        out_shape=jax.ShapeDtypeStruct((N // fold, fold * D), w.dtype),
        grid_spec=pltpu.PrefetchScalarGridSpec(
            num_scalar_prefetch=1,                      # token ids -> SMEM
            grid=(N // tile,),
            in_specs=[
                # Full table, constant block index -> resident in VMEM, no
                # re-fetch across grid steps.  (For large V: pl.ANY + DMA gather.)
                pl.BlockSpec((V, D), lambda i, ids: (0, 0)),
            ],
            out_specs=pl.BlockSpec((rows_per_tile, fold * D),
                                   lambda i, ids: (i, 0)),
        ),
        compiler_params=pltpu.CompilerParams(
            dimension_semantics=("parallel",)),
    )(idx_flat, w)

    return out_folded.reshape(B, S, D)


if __name__ == "__main__":
    feature_dim = 16    # vocabulary size V
    embedding_dim = 32  # D
    B, S = 2, 8

    key = jax.random.PRNGKey(0)
    k_w, k_x = jax.random.split(key)

    # Deterministic init matching: self.embed.weight.data.normal_(0.0, 0.0001)
    w = (jax.random.normal(k_w, (feature_dim, embedding_dim), dtype=jnp.float32)
         * 1e-4)
    x = jax.random.randint(k_x, (B, S), 0, feature_dim, dtype=jnp.int32)

    out = embedding_lookup(x, w)
    out = jax.block_until_ready(out)

    # Reference: plain gather (PyTorch forward semantics)
    ref = jnp.take(w, x, axis=0)

    assert out.shape == (B, S, embedding_dim), out.shape
    assert jnp.allclose(out, ref, atol=1e-6), "mismatch vs reference gather"
    print("KERNEL_OK")
</pallas_src>

<mosaic_0001>
module attributes {stable_mosaic.version = 11 : i64} {
  func.func @kernel(%arg0: i32, %arg1: memref<16xi32, #tpu.memory_space<smem>>, %arg2: memref<16x32xf32, #tpu.memory_space<vmem>>, %arg3: memref<4x128xf32, #tpu.memory_space<vmem>>) attributes {dimension_semantics = [#tpu.dimension_semantics<parallel>], iteration_bounds = array<i64: 1>, scalar_prefetch = 1 : i64, scratch_operands = 0 : i64, tpu.core_type = #tpu.core_type<tc>, window_params = [{pipeline_mode = #tpu.pipeline_mode<synchronous>, transform_indices = @transform_0, window_bounds = array<i64: 16, 32>}, {transform_indices = @transform_1, window_bounds = array<i64: 4, 128>}]} {
    %c16_i32 = arith.constant 16 : i32
    %0 = arith.muli %arg0, %c16_i32 : i32
    %c0_i32 = arith.constant 0 : i32
    %1 = arith.addi %0, %c0_i32 : i32
    %c0_i32_0 = arith.constant 0 : i32
    %2 = arith.addi %1, %c0_i32_0 : i32
    %3 = arith.index_cast %2 : i32 to index
    %4 = memref.load %arg1[%3] : memref<16xi32, #tpu.memory_space<smem>>
    %5 = arith.index_cast %4 : i32 to index
    %c0 = arith.constant 0 : index
    %6 = vector.load %arg2[%5, %c0] : memref<16x32xf32, #tpu.memory_space<vmem>>, vector<1x32xf32>
    %c0_1 = arith.constant 0 : index
    %c0_2 = arith.constant 0 : index
    %7 = vector.load %arg3[%c0_1, %c0_2] : memref<4x128xf32, #tpu.memory_space<vmem>>, vector<1x32xf32>
    tpu.vector_store %arg3[%c0_1, %c0_2], %6 {strides = array<i32>} : memref<4x128xf32, #tpu.memory_space<vmem>>, vector<1x32xf32>,
    %c0_i32_3 = arith.constant 0 : i32
    %8 = arith.addi %0, %c0_i32_3 : i32
    %c1_i32 = arith.constant 1 : i32
    %9 = arith.addi %8, %c1_i32 : i32
    %10 = arith.index_cast %9 : i32 to index
    %11 = memref.load %arg1[%10] : memref<16xi32, #tpu.memory_space<smem>>
    %12 = arith.index_cast %11 : i32 to index
    %c0_4 = arith.constant 0 : index
    %13 = vector.load %arg2[%12, %c0_4] : memref<16x32xf32, #tpu.memory_space<vmem>>, vector<1x32xf32>
    %c0_5 = arith.constant 0 : index
    %c32 = arith.constant 32 : index
    %14 = vector.load %arg3[%c0_5, %c32] : memref<4x128xf32, #tpu.memory_space<vmem>>, vector<1x32xf32>
    tpu.vector_store %arg3[%c0_5, %c32], %13 {strides = array<i32>} : memref<4x128xf32, #tpu.memory_space<vmem>>, vector<1x32xf32>,
    %c0_i32_6 = arith.constant 0 : i32
    %15 = arith.addi %0, %c0_i32_6 : i32
    %c2_i32 = arith.constant 2 : i32
    %16 = arith.addi %15, %c2_i32 : i32
    %17 = arith.index_cast %16 : i32 to index
    %18 = memref.load %arg1[%17] : memref<16xi32, #tpu.memory_space<smem>>
    %19 = arith.index_cast %18 : i32 to index
    %c0_7 = arith.constant 0 : index
    %20 = vector.load %arg2[%19, %c0_7] : memref<16x32xf32, #tpu.memory_space<vmem>>, vector<1x32xf32>
    %c0_8 = arith.constant 0 : index
    %c64 = arith.constant 64 : index
    %21 = vector.load %arg3[%c0_8, %c64] : memref<4x128xf32, #tpu.memory_space<vmem>>, vector<1x32xf32>
    tpu.vector_store %arg3[%c0_8, %c64], %20 {strides = array<i32>} : memref<4x128xf32, #tpu.memory_space<vmem>>, vector<1x32xf32>,
    %c0_i32_9 = arith.constant 0 : i32
    %22 = arith.addi %0, %c0_i32_9 : i32
    %c3_i32 = arith.constant 3 : i32
    %23 = arith.addi %22, %c3_i32 : i32
    %24 = arith.index_cast %23 : i32 to index
    %25 = memref.load %arg1[%24] : memref<16xi32, #tpu.memory_space<smem>>
    %26 = arith.index_cast %25 : i32 to index
    %c0_10 = arith.constant 0 : index
    %27 = vector.load %arg2[%26, %c0_10] : memref<16x32xf32, #tpu.memory_space<vmem>>, vector<1x32xf32>
    %c0_11 = arith.constant 0 : index
    %c96 = arith.constant 96 : index
    %28 = vector.load %arg3[%c0_11, %c96] : memref<4x128xf32, #tpu.memory_space<vmem>>, vector<1x32xf32>
    tpu.vector_store %arg3[%c0_11, %c96], %27 {strides = array<i32>} : memref<4x128xf32, #tpu.memory_space<vmem>>, vector<1x32xf32>,
    %c4_i32 = arith.constant 4 : i32
    %29 = arith.addi %0, %c4_i32 : i32
    %c0_i32_12 = arith.constant 0 : i32
    %30 = arith.addi %29, %c0_i32_12 : i32
    %31 = arith.index_cast %30 : i32 to index
    %32 = memref.load %arg1[%31] : memref<16xi32, #tpu.memory_space<smem>>
    %33 = arith.index_cast %32 : i32 to index
    %c0_13 = arith.constant 0 : index
    %34 = vector.load %arg2[%33, %c0_13] : memref<16x32xf32, #tpu.memory_space<vmem>>, vector<1x32xf32>
    %c1 = arith.constant 1 : index
    %c0_14 = arith.constant 0 : index
    %35 = vector.load %arg3[%c1, %c0_14] : memref<4x128xf32, #tpu.memory_space<vmem>>, vector<1x32xf32>
    tpu.vector_store %arg3[%c1, %c0_14], %34 {strides = array<i32>} : memref<4x128xf32, #tpu.memory_space<vmem>>, vector<1x32xf32>,
    %c4_i32_15 = arith.constant 4 : i32
    %36 = arith.addi %0, %c4_i32_15 : i32
    %c1_i32_16 = arith.constant 1 : i32
    %37 = arith.addi %36, %c1_i32_16 : i32
    %38 = arith.index_cast %37 : i32 to index
    %39 = memref.load %arg1[%38] : memref<16xi32, #tpu.memory_space<smem>>
    %40 = arith.index_cast %39 : i32 to index
    %c0_17 = arith.constant 0 : index
    %41 = vector.load %arg2[%40, %c0_17] : memref<16x32xf32, #tpu.memory_space<vmem>>, vector<1x32xf32>
    %c1_18 = arith.constant 1 : index
    %c32_19 = arith.constant 32 : index
    %42 = vector.load %arg3[%c1_18, %c32_19] : memref<4x128xf32, #tpu.memory_space<vmem>>, vector<1x32xf32>
    tpu.vector_store %arg3[%c1_18, %c32_19], %41 {strides = array<i32>} : memref<4x128xf32, #tpu.memory_space<vmem>>, vector<1x32xf32>,
    %c4_i32_20 = arith.constant 4 : i32
    %43 = arith.addi %0, %c4_i32_20 : i32
    %c2_i32_21 = arith.constant 2 : i32
    %44 = arith.addi %43, %c2_i32_21 : i32
    %45 = arith.index_cast %44 : i32 to index
    %46 = memref.load %arg1[%45] : memref<16xi32, #tpu.memory_space<smem>>
    %47 = arith.index_cast %46 : i32 to index
    %c0_22 = arith.constant 0 : index
    %48 = vector.load %arg2[%47, %c0_22] : memref<16x32xf32, #tpu.memory_space<vmem>>, vector<1x32xf32>
    %c1_23 = arith.constant 1 : index
    %c64_24 = arith.constant 64 : index
    %49 = vector.load %arg3[%c1_23, %c64_24] : memref<4x128xf32, #tpu.memory_space<vmem>>, vector<1x32xf32>
    tpu.vector_store %arg3[%c1_23, %c64_24], %48 {strides = array<i32>} : memref<4x128xf32, #tpu.memory_space<vmem>>, vector<1x32xf32>,
    %c4_i32_25 = arith.constant 4 : i32
    %50 = arith.addi %0, %c4_i32_25 : i32
    %c3_i32_26 = arith.constant 3 : i32
    %51 = arith.addi %50, %c3_i32_26 : i32
    %52 = arith.index_cast %51 : i32 to index
    %53 = memref.load %arg1[%52] : memref<16xi32, #tpu.memory_space<smem>>
    %54 = arith.index_cast %53 : i32 to index
    %c0_27 = arith.constant 0 : index
    %55 = vector.load %arg2[%54, %c0_27] : memref<16x32xf32, #tpu.memory_space<vmem>>, vector<1x32xf32>
    %c1_28 = arith.constant 1 : index
    %c96_29 = arith.constant 96 : index
    %56 = vector.load %arg3[%c1_28, %c96_29] : memref<4x128xf32, #tpu.memory_space<vmem>>, vector<1x32xf32>
    tpu.vector_store %arg3[%c1_28, %c96_29], %55 {strides = array<i32>} : memref<4x128xf32, #tpu.memory_space<vmem>>, vector<1x32xf32>,
    %c8_i32 = arith.constant 8 : i32
    %57 = arith.addi %0, %c8_i32 : i32
    %c0_i32_30 = arith.constant 0 : i32
    %58 = arith.addi %57, %c0_i32_30 : i32
    %59 = arith.index_cast %58 : i32 to index
    %60 = memref.load %arg1[%59] : memref<16xi32, #tpu.memory_space<smem>>
    %61 = arith.index_cast %60 : i32 to index
    %c0_31 = arith.constant 0 : index
    %62 = vector.load %arg2[%61, %c0_31] : memref<16x32xf32, #tpu.memory_space<vmem>>, vector<1x32xf32>
    %c2 = arith.constant 2 : index
    %c0_32 = arith.constant 0 : index
    %63 = vector.load %arg3[%c2, %c0_32] : memref<4x128xf32, #tpu.memory_space<vmem>>, vector<1x32xf32>
    tpu.vector_store %arg3[%c2, %c0_32], %62 {strides = array<i32>} : memref<4x128xf32, #tpu.memory_space<vmem>>, vector<1x32xf32>,
    %c8_i32_33 = arith.constant 8 : i32
    %64 = arith.addi %0, %c8_i32_33 : i32
    %c1_i32_34 = arith.constant 1 : i32
    %65 = arith.addi %64, %c1_i32_34 : i32
    %66 = arith.index_cast %65 : i32 to index
    %67 = memref.load %arg1[%66] : memref<16xi32, #tpu.memory_space<smem>>
    %68 = arith.index_cast %67 : i32 to index
    %c0_35 = arith.constant 0 : index
    %69 = vector.load %arg2[%68, %c0_35] : memref<16x32xf32, #tpu.memory_space<vmem>>, vector<1x32xf32>
    %c2_36 = arith.constant 2 : index
    %c32_37 = arith.constant 32 : index
    %70 = vector.load %arg3[%c2_36, %c32_37] : memref<4x128xf32, #tpu.memory_space<vmem>>, vector<1x32xf32>
    tpu.vector_store %arg3[%c2_36, %c32_37], %69 {strides = array<i32>} : memref<4x128xf32, #tpu.memory_space<vmem>>, vector<1x32xf32>,
    %c8_i32_38 = arith.constant 8 : i32
    %71 = arith.addi %0, %c8_i32_38 : i32
    %c2_i32_39 = arith.constant 2 : i32
    %72 = arith.addi %71, %c2_i32_39 : i32
    %73 = arith.index_cast %72 : i32 to index
    %74 = memref.load %arg1[%73] : memref<16xi32, #tpu.memory_space<smem>>
    %75 = arith.index_cast %74 : i32 to index
    %c0_40 = arith.constant 0 : index
    %76 = vector.load %arg2[%75, %c0_40] : memref<16x32xf32, #tpu.memory_space<vmem>>, vector<1x32xf32>
    %c2_41 = arith.constant 2 : index
    %c64_42 = arith.constant 64 : index
    %77 = vector.load %arg3[%c2_41, %c64_42] : memref<4x128xf32, #tpu.memory_space<vmem>>, vector<1x32xf32>
    tpu.vector_store %arg3[%c2_41, %c64_42], %76 {strides = array<i32>} : memref<4x128xf32, #tpu.memory_space<vmem>>, vector<1x32xf32>,
    %c8_i32_43 = arith.constant 8 : i32
    %78 = arith.addi %0, %c8_i32_43 : i32
    %c3_i32_44 = arith.constant 3 : i32
    %79 = arith.addi %78, %c3_i32_44 : i32
    %80 = arith.index_cast %79 : i32 to index
    %81 = memref.load %arg1[%80] : memref<16xi32, #tpu.memory_space<smem>>
    %82 = arith.index_cast %81 : i32 to index
    %c0_45 = arith.constant 0 : index
    %83 = vector.load %arg2[%82, %c0_45] : memref<16x32xf32, #tpu.memory_space<vmem>>, vector<1x32xf32>
    %c2_46 = arith.constant 2 : index
    %c96_47 = arith.constant 96 : index
    %84 = vector.load %arg3[%c2_46, %c96_47] : memref<4x128xf32, #tpu.memory_space<vmem>>, vector<1x32xf32>
    tpu.vector_store %arg3[%c2_46, %c96_47], %83 {strides = array<i32>} : memref<4x128xf32, #tpu.memory_space<vmem>>, vector<1x32xf32>,
    %c12_i32 = arith.constant 12 : i32
    %85 = arith.addi %0, %c12_i32 : i32
    %c0_i32_48 = arith.constant 0 : i32
    %86 = arith.addi %85, %c0_i32_48 : i32
    %87 = arith.index_cast %86 : i32 to index
    %88 = memref.load %arg1[%87] : memref<16xi32, #tpu.memory_space<smem>>
    %89 = arith.index_cast %88 : i32 to index
    %c0_49 = arith.constant 0 : index
    %90 = vector.load %arg2[%89, %c0_49] : memref<16x32xf32, #tpu.memory_space<vmem>>, vector<1x32xf32>
    %c3 = arith.constant 3 : index
    %c0_50 = arith.constant 0 : index
    %91 = vector.load %arg3[%c3, %c0_50] : memref<4x128xf32, #tpu.memory_space<vmem>>, vector<1x32xf32>
    tpu.vector_store %arg3[%c3, %c0_50], %90 {strides = array<i32>} : memref<4x128xf32, #tpu.memory_space<vmem>>, vector<1x32xf32>,
    %c12_i32_51 = arith.constant 12 : i32
    %92 = arith.addi %0, %c12_i32_51 : i32
    %c1_i32_52 = arith.constant 1 : i32
    %93 = arith.addi %92, %c1_i32_52 : i32
    %94 = arith.index_cast %93 : i32 to index
    %95 = memref.load %arg1[%94] : memref<16xi32, #tpu.memory_space<smem>>
    %96 = arith.index_cast %95 : i32 to index
    %c0_53 = arith.constant 0 : index
    %97 = vector.load %arg2[%96, %c0_53] : memref<16x32xf32, #tpu.memory_space<vmem>>, vector<1x32xf32>
    %c3_54 = arith.constant 3 : index
    %c32_55 = arith.constant 32 : index
    %98 = vector.load %arg3[%c3_54, %c32_55] : memref<4x128xf32, #tpu.memory_space<vmem>>, vector<1x32xf32>
    tpu.vector_store %arg3[%c3_54, %c32_55], %97 {strides = array<i32>} : memref<4x128xf32, #tpu.memory_space<vmem>>, vector<1x32xf32>,
    %c12_i32_56 = arith.constant 12 : i32
    %99 = arith.addi %0, %c12_i32_56 : i32
    %c2_i32_57 = arith.constant 2 : i32
    %100 = arith.addi %99, %c2_i32_57 : i32
    %101 = arith.index_cast %100 : i32 to index
    %102 = memref.load %arg1[%101] : memref<16xi32, #tpu.memory_space<smem>>
    %103 = arith.index_cast %102 : i32 to index
    %c0_58 = arith.constant 0 : index
    %104 = vector.load %arg2[%103, %c0_58] : memref<16x32xf32, #tpu.memory_space<vmem>>, vector<1x32xf32>
    %c3_59 = arith.constant 3 : index
    %c64_60 = arith.constant 64 : index
    %105 = vector.load %arg3[%c3_59, %c64_60] : memref<4x128xf32, #tpu.memory_space<vmem>>, vector<1x32xf32>
    tpu.vector_store %arg3[%c3_59, %c64_60], %104 {strides = array<i32>} : memref<4x128xf32, #tpu.memory_space<vmem>>, vector<1x32xf32>,
    %c12_i32_61 = arith.constant 12 : i32
    %106 = arith.addi %0, %c12_i32_61 : i32
    %c3_i32_62 = arith.constant 3 : i32
    %107 = arith.addi %106, %c3_i32_62 : i32
    %108 = arith.index_cast %107 : i32 to index
    %109 = memref.load %arg1[%108] : memref<16xi32, #tpu.memory_space<smem>>
    %110 = arith.index_cast %109 : i32 to index
    %c0_63 = arith.constant 0 : index
    %111 = vector.load %arg2[%110, %c0_63] : memref<16x32xf32, #tpu.memory_space<vmem>>, vector<1x32xf32>
    %c3_64 = arith.constant 3 : index
    %c96_65 = arith.constant 96 : index
    %112 = vector.load %arg3[%c3_64, %c96_65] : memref<4x128xf32, #tpu.memory_space<vmem>>, vector<1x32xf32>
    tpu.vector_store %arg3[%c3_64, %c96_65], %111 {strides = array<i32>} : memref<4x128xf32, #tpu.memory_space<vmem>>, vector<1x32xf32>,
    return
  }
  func.func @transform_0(%arg0: i32, %arg1: memref<16xi32, #tpu.memory_space<smem>>) -> (i32, i32) {
    %c0_i32 = arith.constant 0 : i32
    %c0_i32_0 = arith.constant 0 : i32
    %c0_i32_1 = arith.constant 0 : i32
    return %c0_i32, %c0_i32_0 : i32, i32
  }
  func.func @transform_1(%arg0: i32, %arg1: memref<16xi32, #tpu.memory_space<smem>>) -> (i32, i32) {
    %c0_i32 = arith.constant 0 : i32
    %c0_i32_0 = arith.constant 0 : i32
    return %arg0, %c0_i32 : i32, i32
  }
}

</mosaic_0001>

<bundles_post_ra>
// kernel: tpu_custom_call.1
= control target key start
LH: loop header
LB: loop body
LE: loop exit
PB: predicated region body
PF: predicated region fallthrough
CT: control target
= control target key end

     0   :  { %s352_s0 = inlined_call_operand.hbm [shape: s32[16], index: 0, kind: input, shape index: {}]   ;;  %s353_s1 = inlined_call_operand.hbm [shape: f32[16,32], index: 1, kind: input, shape index: {}]   ;;  %s354_s2 = inlined_call_operand.hbm [shape: f32[4,128], index: 2, kind: output, shape index: {}]  }
   0x1   :  { %s214_s11 = scalar_lea.hbm %s352_s0, 16 }
   0x2   :  { %p215_p0 = scmp.ne.s32.totalorder %s352_s0, %s214_s11  ;;  %p218_p1 = scmp.lt.u32.totalorder %s214_s11, %s352_s0 }
   0x4   :  { %p220_p2 = pnand %p218_p1, %p215_p0 }
   0x6   :  { %223 = shalt.err (!%p220_p2)  }
   0x7   :  { %s274_s16 = smov [#allocation3]  }
   0x8   :  { %8 = dma.hbm_to_smem %s352_s0, 16, %s274_s16, [#allocation2] }
   0x9   :  { %268 = dma.done.wait [#allocation2], 16 }
   0xa   :  { %269 = vsyncadd [#allocation2], 4294967280 }
   0xb   :  { %10 = sfence }
   0xc   :  { %11 = vsyncpa [#allocation5], 0 }
   0xd   :  { %12 = vsyncpa [#allocation6], 0  ;;  %s275_s19 = smov [#allocation4]   ;;  %s224_s23 = scalar_lea.hbm %s353_s1, 256 }
   0xe   :  { %s18_s20 = sshll.u32 %s275_s19, 4  ;;  %p225_p3 = scmp.ne.s32.totalorder %s353_s1, %s224_s23  ;;  %s19_s20 = int_to_ptr.vmem [resolvable:$true] %s18_s20 }
   0xf   :  { %p228_p4 = scmp.lt.u32.totalorder %s224_s23, %s353_s1 }
  0x11   :  { %p230_p5 = pnand %p228_p4, %p225_p3 }
  0x13   :  { %233 = shalt.err (!%p230_p5)
}
  0x14   :  { %s234_s0 = scalar_lea.vmem %s19_s20, 256  ;;  %p239_p7 = scmp.lt.s32.totalorder %s19_s20, %s19_s20 }
  0x15   :  { %p235_p6 = scmp.ne.s32.totalorder %s19_s20, %s234_s0  ;;  %p240_p8 = scmp.lt.s32.totalorder %s234_s0, %s234_s0 }
  0x17   :  { %p241_p9 = por %p240_p8, %p239_p7 }
  0x19   :  { %p242_p10 = pnand %p241_p9, %p235_p6 }
  0x1b   :  { %245 = shalt.err (!%p242_p10)
}
  0x1c   :  { %s276_s28 = smov 128   ;;  %s277_s29 = smov 8  }
  0x1d   :  { %24 = dma.hbm_to_vmem [thread:$0]  %s353_s1, 256, %s19_s20, [#allocation5], %s276_s28, %s276_s28, %s277_s29  }
  0x1e   :  { %270 = dma.done.wait [#allocation5], 256  }
  0x1f   :  { %271 = vsyncadd [#allocation5], 4294967040  ;;  %s199_s4 = sld [smem:[#allocation3 + $0x9]]  ;;  %s203_s6 = sld [smem:[#allocation3 + $0xd]]  ;;  %vm32_vm0 = vcmask 253952   ;;  %vm42_vm1 = vcmask 516352  }
  0x20   :  { %s191_s5 = sld [smem:[#allocation3 + $0x1]]  ;;  %s195_s7 = sld [smem:[#allocation3 + $0x5]]  ;;  %vm52_vm2 = vcmask 778752   ;;  %vm62_vm3 = vcmask 1041152  }
  0x21   :  { %s196_s8 = sld [smem:[#allocation3 + $0x6]]  ;;  %s192_s9 = sld [smem:[#allocation3 + $0x2]] }
  0x22   :  { %s321_s10 = sld [smem:[#allocation3 + $0xe]]  ;;  %s323_s11 = sld [smem:[#allocation3 + $0xa]] }
  0x23   :  { %s278_s14 = smov 32   ;;  %s197_s1 = sld [smem:[#allocation3 + $0x7]] }
  0x24   :  { %s325_s17 = sld [smem:[#allocation3 + $0x3]]  ;;  %s327_s18 = sld [smem:[#allocation3 + $0xf]] }
  0x25   :  { %s103_s12 = scalar_lea.vmem [#allocation4], %s199_s4  ;;  %s135_s15 = scalar_lea.vmem [#allocation4], %s203_s6 }
  0x26   :  { %v104_v0 = vld [vmem:[%s103_s12] sm:$0x1]  ;;  %s36_s13 = scalar_lea.vmem [#allocation4], %s191_s5  ;;  %s71_s16 = scalar_lea.vmem [#allocation4], %s195_s7 }
  0x27   :  { %v37_v1 = vld [vmem:[%s36_s13] sm:$0x1]  ;;  %106 = vrot.lane.b32.xlu1 %v104_v0, %s278_s14  ;;  %s80_s19 = scalar_lea.vmem [#allocation4], %s196_s8  ;;  %s329_s20 = sld [smem:[#allocation3 + $0xb]] }
  0x28   :  { %39 = vrot.lane.b32.xlu0 %v37_v1, %s278_s14  ;;  %v136_v2 = vld [vmem:[%s135_s15] sm:$0x1]  ;;  %s46_s21 = scalar_lea.vmem [#allocation4], %s192_s9  ;;  %s198_s22 = sld [smem:[#allocation3 + $0x8]] }
  0x29   :  { %v72_v3 = vld [vmem:[%s71_s16] sm:$0x1]  ;;  %s29_s23 = sld [smem:[#allocation3]]  ;;  %s202_s24 = sld [smem:[#allocation3 + $0xc]] }
  0x2a   :  { %v81_v4 = vld [vmem:[%s80_s19] sm:$0x1]  ;;  %s194_s25 = sld [smem:[#allocation3 + $0x4]]  ;;  %s279_s26 = smov 64  }
  0x2b   :  { %138 = vrot.lane.b32.xlu1 %v136_v2, %s278_s14  ;;  %v47_v5 = vld [vmem:[%s46_s21] sm:$0x1]  ;;  %s144_s27 = scalar_lea.vmem [#allocation4], %s321_s10  ;;  %s112_s0 = scalar_lea.vmem [#allocation4], %s323_s11 }
  0x2c   :  { %74 = vrot.lane.b32.xlu0 %v72_v3, %s278_s14  ;;  %v145_v6 = vld [vmem:[%s144_s27] sm:$0x1]  ;;  %s89_s28 = scalar_lea.vmem [#allocation4], %s197_s1  ;;  %s56_s3 = scalar_lea.vmem [#allocation4], %s325_s17 }
  0x2d   :  { %v113_v7 = vld [vmem:[%s112_s0] sm:$0x1]  ;;  %s280_s6 = smov 96   ;;  %s153_s7 = scalar_lea.vmem [#allocation4], %s327_s18 }
  0x2e   :  { %v90_v8 = vld [vmem:[%s89_s28] sm:$0x1]  ;;  %s98_s29 = scalar_lea.vmem [#allocation4], %s198_s22  ;;  %s121_s8 = scalar_lea.vmem [#allocation4], %s329_s20 }
  0x2f   :  { %83 = vrot.lane.b32.xlu1 %v81_v4, %s279_s26  ;;  %v99_v9 = vld [vmem:[%s98_s29] sm:$0x1]  ;;  %s30_s30 = scalar_lea.vmem [#allocation4], %s29_s23  ;;  %s130_s4 = scalar_lea.vmem [#allocation4], %s202_s24 }
  0x30   :  { %49 = vrot.lane.b32.xlu0 %v47_v5, %s279_s26  ;;  %v31_v10 = vld [vmem:[%s30_s30] sm:$0x1]  ;;  %100 = vst.msk [vmem:[#allocation7 + $0x2] sm:$0x1] %vm32_vm0, %v99_v9  ;;  %s66_s5 = scalar_lea.vmem [#allocation4], %s194_s25  ;;  %s281_s9 = smov [#allocation7]  }
  0x31   :  { %v57_v11 = vld [vmem:[%s56_s3] sm:$0x1]  ;;  %33 = vst.msk [vmem:[#allocation7] sm:$0x1] %vm32_vm0, %v31_v10  ;;  %s166_s10 = sshll.u32 %s281_s9, 4  ;;  %s167_s10 = int_to_ptr.vmem [resolvable:$true] %s166_s10 }
  0x32   :  { %v131_v12 = vld [vmem:[%s130_s4] sm:$0x1]  ;;  %s246_s11 = scalar_lea.vmem %s167_s10, 64  ;;  %p251_p12 = scmp.lt.s32.totalorder %s167_s10, %s167_s10 }
  0x33   :  { %147 = vrot.lane.b32.xlu1 %v145_v6, %s279_s26  ;;  %v67_v13 = vld [vmem:[%s66_s5] sm:$0x1]  ;;  %132 = vst.msk [vmem:[#allocation7 + $0x3] sm:$0x1] %vm32_vm0, %v131_v12  ;;  %p247_p11 = scmp.ne.s32.totalorder %s167_s10, %s246_s11  ;;  %p252_p13 = scmp.lt.s32.totalorder %s246_s11, %s246_s11 }
  0x34   :  { %115 = vrot.lane.b32.xlu0 %v113_v7, %s279_s26  ;;  %68 = vst.msk [vmem:[#allocation7 + $0x1] sm:$0x1] %vm32_vm0, %v67_v13  ;;  %v154_v14 = vld [vmem:[%s153_s7] sm:$0x1] }
  0x35   :  { %v122_v15 = vld [vmem:[%s121_s8] sm:$0x1]  ;;  %p253_p0 = por %p252_p13, %p251_p12 }
  0x37   :  { %92 = vrot.lane.b32.xlu1 %v90_v8, %s280_s6  ;;  %p254_p1 = pnand %p253_p0, %p247_p11 }
  0x38   :  { %59 = vrot.lane.b32.xlu0 %v57_v11, %s280_s6 }
  0x3b   :  { %156 = vrot.lane.b32.xlu1 %v154_v14, %s280_s6 }
  0x3c   :  { %124 = vrot.lane.b32.xlu0 %v122_v15, %s280_s6 }
  0x99   :  { %v107_v16 = vpop.permute.xlu1 %106 }
  0x9a   :  { %v40_v17 = vpop.permute.xlu0 %39  ;;  %109 = vst.msk [vmem:[#allocation7 + $0x2] sm:$0x1] %vm42_vm1, %v107_v16 }
  0x9b   :  { %43 = vst.msk [vmem:[#allocation7] sm:$0x1] %vm42_vm1, %v40_v17 }
  0x9d   :  { %v139_v18 = vpop.permute.xlu1 %138 }
  0x9e   :  { %v75_v19 = vpop.permute.xlu0 %74  ;;  %141 = vst.msk [vmem:[#allocation7 + $0x3] sm:$0x1] %vm42_vm1, %v139_v18 }
  0x9f   :  { %77 = vst.msk [vmem:[#allocation7 + $0x1] sm:$0x1] %vm42_vm1, %v75_v19 }
  0xa1   :  { %v84_v20 = vpop.permute.xlu1 %83 }
  0xa2   :  { %v50_v21 = vpop.permute.xlu0 %49  ;;  %86 = vst.msk [vmem:[#allocation7 + $0x1] sm:$0x1] %vm52_vm2, %v84_v20 }
  0xa3   :  { %53 = vst.msk [vmem:[#allocation7] sm:$0x1] %vm52_vm2, %v50_v21 }
  0xa5   :  { %v148_v22 = vpop.permute.xlu1 %147 }
  0xa6   :  { %v116_v23 = vpop.permute.xlu0 %115  ;;  %150 = vst.msk [vmem:[#allocation7 + $0x3] sm:$0x1] %vm52_vm2, %v148_v22 }
  0xa7   :  { %118 = vst.msk [vmem:[#allocation7 + $0x2] sm:$0x1] %vm52_vm2, %v116_v23 }
  0xa9   :  { %v93_v24 = vpop.permute.xlu1 %92 }
  0xaa   :  { %v60_v25 = vpop.permute.xlu0 %59  ;;  %95 = vst.msk [vmem:[#allocation7 + $0x1] sm:$0x1] %vm62_vm3, %v93_v24 }
  0xab   :  { %63 = vst.msk [vmem:[#allocation7] sm:$0x1] %vm62_vm3, %v60_v25 }
  0xad   :  { %v157_v26 = vpop.permute.xlu1 %156 }
  0xae   :  { %v125_v27 = vpop.permute.xlu0 %124  ;;  %159 = vst.msk [vmem:[#allocation7 + $0x3] sm:$0x1] %vm62_vm3, %v157_v26 }
  0xaf   :  { %127 = vst.msk [vmem:[#allocation7 + $0x2] sm:$0x1] %vm62_vm3, %v125_v27 }
  0xb0   :  { %257 = shalt.err (!%p254_p1)
}
  0xb1   :  { %s258_s14 = scalar_lea.hbm %s354_s2, 64 }
  0xb2   :  { %p259_p2 = scmp.ne.s32.totalorder %s354_s2, %s258_s14  ;;  %p262_p3 = scmp.lt.u32.totalorder %s258_s14, %s354_s2 }
  0xb4   :  { %p264_p4 = pnand %p262_p3, %p259_p2 }
  0xb6   :  { %267 = shalt.err (!%p264_p4)
}
  0xb7   :  { %169 = dma.vmem_to_hbm [thread:$0]  %s167_s10, 64, %s354_s2, [#allocation6]  }
  0xb8   :  { %272 = dma.done.wait [#allocation6], 64  }
  0xb9   :  { %273 = vsyncadd [#allocation6], 4294967232 }
  0xba   :  { %173 = vsyncpa [#allocation5], 1 }
  0xbb   :  { %174 = vsyncpa [#allocation6], 1 }

</bundles_post_ra>
